<compile_context>
chip_gen: v5e
topology: v5e:2x2
jax: 0.10.0
libtpu: 0.0.40
codegen_flags: <defaults>
</compile_context>

<pallas_src>
import jax
import jax.numpy as jnp
from jax import lax
from jax.experimental import pallas as pl
from jax.experimental.pallas import tpu as pltpu

_LANES = 128
_CHUNK = 8                                # sublane rows per inner-loop step
_DATA_VMEM_BUDGET = 20 * 1024 * 1024      # double-buffered data-stream budget
_VMEM_LIMIT = 32 * 1024 * 1024            # scoped VMEM limit (safe on v5e/v6e/v7x)


def _cdiv(a, b):
    return -(-a // b)


def _make_yolo_kernel(*, num_classes, dp, tile_r, unroll):
    """Build kernel for static (num_classes, dp=5+C, tile_r, unroll)."""
    n_chunks = tile_r // _CHUNK
    t_x_c, t_y_c, t_w_c, t_h_c = dp, dp + 1, dp + 2, dp + 3
    picked_c, t_obj_c = dp + 4, dp + 5

    def kernel(anch_ref, data_ref, out_ref):
        a = pl.program_id(1)          # anchor index (selects anchor block)
        i = pl.program_id(2)          # row-tile step within this half

        @pl.when(jnp.logical_and(a == 0, i == 0))
        def _init():
            out_ref[...] = jnp.zeros_like(out_ref)

        aw = anch_ref[0, 0]           # (8,128) anchor width (pre-broadcast)
        ah = anch_ref[0, 1]           # anchor height
        inv_aw = anch_ref[0, 2]       # precomputed 1/aw (no per-step divide)
        inv_ah = anch_ref[0, 3]

        def body(c, carry):
            acc_obj, acc_noobj, cnt_obj, cnt_noobj = carry
            r0 = pl.multiple_of(c * _CHUNK, _CHUNK)

            def ld(f):
                return data_ref[0, f, pl.ds(r0, _CHUNK), :]

            p_obj = ld(0)
            p_x, p_y, p_w, p_h = ld(1), ld(2), ld(3), ld(4)
            t_x, t_y = ld(t_x_c), ld(t_y_c)
            t_w, t_h = ld(t_w_c), ld(t_h_c)
            picked = ld(picked_c)     # logit of the target class (pre-gathered)
            t_obj = ld(t_obj_c)       # padding sentinel is -1: neither mask hits

            zero = jnp.zeros_like(p_obj)
            one = jnp.ones_like(p_obj)

            obj_m = t_obj == 1.0
            noobj_m = t_obj == 0.0
            cnt_obj = cnt_obj + jnp.where(obj_m, one, zero)
            cnt_noobj = cnt_noobj + jnp.where(noobj_m, one, zero)

            # ---- no-object loss: BCEWithLogits(p_obj, 0) == softplus(p_obj)
            softplus = jnp.maximum(p_obj, 0.0) + jnp.log1p(jnp.exp(-jnp.abs(p_obj)))
            acc_noobj = acc_noobj + jnp.where(noobj_m, softplus, zero)

            # ---- IoU(decoded pred box, target box), midpoint format
            sx = jax.nn.sigmoid(p_x)
            sy = jax.nn.sigmoid(p_y)
            ew = jnp.exp(p_w) * aw
            eh = jnp.exp(p_h) * ah
            b1x1 = sx - 0.5 * ew
            b1x2 = sx + 0.5 * ew
            b1y1 = sy - 0.5 * eh
            b1y2 = sy + 0.5 * eh
            b2x1 = t_x - 0.5 * t_w
            b2x2 = t_x + 0.5 * t_w
            b2y1 = t_y - 0.5 * t_h
            b2y2 = t_y + 0.5 * t_h
            iw = jnp.maximum(jnp.minimum(b1x2, b2x2) - jnp.maximum(b1x1, b2x1), 0.0)
            ih = jnp.maximum(jnp.minimum(b1y2, b2y2) - jnp.maximum(b1y1, b2y1), 0.0)
            inter = iw * ih
            area1 = jnp.abs((b1x2 - b1x1) * (b1y2 - b1y1))
            area2 = jnp.abs((b2x2 - b2x1) * (b2y2 - b2y1))
            # exact divide kept: approx EUP reciprocal (~1e-3 rel err) would
            # break the f32 reference tolerance.
            iou = inter / (area1 + area2 - inter + 1e-6)

            # ---- object loss term: (sigmoid(p_obj) - iou * t_obj)^2
            sig_obj = jax.nn.sigmoid(p_obj)
            obj_err = (sig_obj - iou * t_obj) ** 2

            # ---- box loss terms: MSE([sig_xy, wh-logit], [t_xy, log(t_wh/anchor)])
            tw_log = jnp.log(1e-16 + t_w * inv_aw)
            th_log = jnp.log(1e-16 + t_h * inv_ah)
            box_sq = ((sx - t_x) ** 2 + (sy - t_y) ** 2
                      + (p_w - tw_log) ** 2 + (p_h - th_log) ** 2)

            # ---- class loss: logsumexp(logits) - picked, logits loaded once
            if num_classes <= 16:
                lgs = [ld(5 + k) for k in range(num_classes)]
                lmax = lgs[0]
                for k in range(1, num_classes):
                    lmax = jnp.maximum(lmax, lgs[k])
                sum_exp = jnp.exp(lgs[0] - lmax)
                for k in range(1, num_classes):
                    sum_exp = sum_exp + jnp.exp(lgs[k] - lmax)
            else:
                # large C: two-pass reload keeps the live vreg set small
                lmax = ld(5)
                for k in range(1, num_classes):
                    lmax = jnp.maximum(lmax, ld(5 + k))
                sum_exp = zero
                for k in range(num_classes):
                    sum_exp = sum_exp + jnp.exp(ld(5 + k) - lmax)
            ce = lmax + jnp.log(sum_exp) - picked

            # fold lambdas sharing the 1/n_obj divisor:
            #   10*box/(4 n) + 1*obj/n + 1*ce/n == (2.5*box + obj + ce)/n
            obj_part = 2.5 * box_sq + obj_err + ce
            acc_obj = acc_obj + jnp.where(obj_m, obj_part, zero)
            return acc_obj, acc_noobj, cnt_obj, cnt_noobj

        z = jnp.zeros((_CHUNK, _LANES), jnp.float32)
        acc_obj, acc_noobj, cnt_obj, cnt_noobj = lax.fori_loop(
            0, n_chunks, body, (z, z, z, z), unroll=unroll)

        # accumulate into the VMEM-resident output block (no XLU reductions)
        out_ref[0, 0] += acc_obj
        out_ref[0, 1] += acc_noobj
        out_ref[0, 2] += cnt_obj
        out_ref[0, 3] += cnt_noobj

    return kernel


def yolo_loss(predictions, target, anchors, *, max_tile_rows=512):
    """predictions: (N,3,S,S,5+C), target: (N,3,S,S,6), anchors: (3,2) -> scalar."""
    N, A, S, S2, DP = predictions.shape
    assert A == 3 and S == S2 and target.shape == (N, A, S, S, 6)
    C = DP - 5
    F = DP + 6                        # preds + (tx,ty,tw,th) + picked + t_obj
    Ma = N * S * S                    # grid cells per anchor

    R = _cdiv(Ma, _LANES)             # 128-lane rows per anchor
    half = _cdiv(R, 2)                # rows per parallel half
    # VMEM-budgeted tile size: double-buffered data block stays <= budget so
    # large num_classes still fits v7x's 64 MiB VMEM.
    row_bytes = F * _LANES * 4
    tile_cap = max(_CHUNK, min(max_tile_rows,
                               (_DATA_VMEM_BUDGET // (2 * row_bytes)) // _CHUNK * _CHUNK))
    steps = max(1, _cdiv(half, tile_cap))
    tile_r = max(_CHUNK, _cdiv(_cdiv(half, steps), _CHUNK) * _CHUNK)  # min padding
    n_chunks = tile_r // _CHUNK
    unroll = 2 if (n_chunks % 2 == 0 and C <= 16) else 1
    r_pad = 2 * steps * tile_r
    ma_pad = r_pad * _LANES
    pad_n = ma_pad - Ma

    # ---- lane-dense pack: (3, F, r_pad, 128), anchor-major, channel-major ----
    pred_t = jnp.moveaxis(predictions.astype(jnp.float32), 1, 0).reshape(3, Ma, DP)
    targ_t = jnp.moveaxis(target.astype(jnp.float32), 1, 0).reshape(3, Ma, 6)
    label = targ_t[..., 5].astype(jnp.int32)
    picked = jnp.take_along_axis(pred_t[..., 5:], label[..., None], axis=-1)  # (3,Ma,1)
    main = jnp.concatenate([pred_t, targ_t[..., 1:5], picked], axis=-1)       # (3,Ma,DP+5)
    main = jnp.pad(main, ((0, 0), (0, pad_n), (0, 0)))
    # -1 sentinel on the objectness channel: padded cells match neither mask,
    # so no per-chunk validity iota is needed in the kernel.
    tobj = jnp.pad(targ_t[..., 0:1], ((0, 0), (0, pad_n), (0, 0)),
                   constant_values=-1.0)
    data = jnp.concatenate([main, tobj], axis=-1)                             # (3,ma_pad,F)
    data = jnp.transpose(data, (0, 2, 1)).reshape(3, F, r_pad, _LANES)
    # TODO(synk): streaming this block in bf16 would halve HBM traffic but changes
    # numerics vs the f32 PyTorch forward; kept f32 to preserve exact semantics.

    # tiny anchor block: (aw, ah, 1/aw, 1/ah) pre-broadcast to one (8,128) plane each
    anc = anchors.astype(jnp.float32)
    anch_feats = jnp.stack([anc[:, 0], anc[:, 1], 1.0 / anc[:, 0], 1.0 / anc[:, 1]],
                           axis=1)                                            # (3,4)
    anch_b = jnp.broadcast_to(anch_feats.reshape(3, 4, 1, 1), (3, 4, _CHUNK, _LANES))

    kernel = _make_yolo_kernel(num_classes=C, dp=DP, tile_r=tile_r, unroll=unroll)

    partials = pl.pallas_call(
        kernel,
        out_shape=jax.ShapeDtypeStruct((2, 4, _CHUNK, _LANES), jnp.float32),
        grid_spec=pltpu.PrefetchScalarGridSpec(
            num_scalar_prefetch=0,
            grid=(2, 3, steps),
            in_specs=[
                pl.BlockSpec((1, 4, _CHUNK, _LANES),
                             lambda p, a, i: (a, 0, 0, 0)),
                pl.BlockSpec((1, F, tile_r, _LANES),
                             lambda p, a, i: (a, 0, p * steps + i, 0)),
            ],
            out_specs=pl.BlockSpec((1, 4, _CHUNK, _LANES),
                                   lambda p, a, i: (p, 0, 0, 0)),
        ),
        compiler_params=pltpu.CompilerParams(
            dimension_semantics=("parallel", "arbitrary", "arbitrary"),
            # allow XLA to fuse the pack (moveaxis/concat/pad/transpose) into the
            # kernel's data input instead of materialising a second HBM copy.
            allow_input_fusion=[False, True],
            vmem_limit_bytes=_VMEM_LIMIT),
    )(anch_b, data)

    # final tiny reduction + lambda-weighted combination in JAX
    sums = jnp.sum(partials, axis=(0, 2, 3))  # [sum_obj_terms, sum_noobj, n_obj, n_noobj]
    return sums[0] / sums[2] + 10.0 * sums[1] / sums[3]


def yolo_loss_ref(pred, targ, anchors):
    """Pure-JAX reference mirroring the PyTorch forward."""
    pred = pred.astype(jnp.float32)
    targ = targ.astype(jnp.float32)
    t0 = targ[..., 0]
    obj = t0 == 1.0
    noobj = t0 == 0.0
    n_obj = jnp.sum(obj).astype(jnp.float32)
    n_noobj = jnp.sum(noobj).astype(jnp.float32)

    p0 = pred[..., 0]
    bce = jnp.maximum(p0, 0.0) - p0 * t0 + jnp.log1p(jnp.exp(-jnp.abs(p0)))
    no_object_loss = jnp.sum(jnp.where(noobj, bce, 0.0)) / n_noobj

    anch = anchors.reshape(1, 3, 1, 1, 2)
    sig_xy = jax.nn.sigmoid(pred[..., 1:3])
    exp_wh = jnp.exp(pred[..., 3:5]) * anch
    t_xy = targ[..., 1:3]
    t_wh = targ[..., 3:5]

    b1x1 = sig_xy[..., 0] - exp_wh[..., 0] / 2
    b1y1 = sig_xy[..., 1] - exp_wh[..., 1] / 2
    b1x2 = sig_xy[..., 0] + exp_wh[..., 0] / 2
    b1y2 = sig_xy[..., 1] + exp_wh[..., 1] / 2
    b2x1 = t_xy[..., 0] - t_wh[..., 0] / 2
    b2y1 = t_xy[..., 1] - t_wh[..., 1] / 2
    b2x2 = t_xy[..., 0] + t_wh[..., 0] / 2
    b2y2 = t_xy[..., 1] + t_wh[..., 1] / 2
    inter = (jnp.maximum(jnp.minimum(b1x2, b2x2) - jnp.maximum(b1x1, b2x1), 0.0) *
             jnp.maximum(jnp.minimum(b1y2, b2y2) - jnp.maximum(b1y1, b2y1), 0.0))
    a1 = jnp.abs((b1x2 - b1x1) * (b1y2 - b1y1))
    a2 = jnp.abs((b2x2 - b2x1) * (b2y2 - b2y1))
    iou = inter / (a1 + a2 - inter + 1e-6)

    object_loss = jnp.sum(jnp.where(obj, (jax.nn.sigmoid(p0) - iou * t0) ** 2, 0.0)) / n_obj

    t_wh_log = jnp.log(1e-16 + t_wh / anch)
    box_sq = (sig_xy - t_xy) ** 2 + (pred[..., 3:5] - t_wh_log) ** 2
    box_loss = jnp.sum(jnp.where(obj[..., None], box_sq, 0.0)) / (4.0 * n_obj)

    logits = pred[..., 5:]
    label = targ[..., 5].astype(jnp.int32)
    lse = jax.scipy.special.logsumexp(logits, axis=-1)
    picked = jnp.take_along_axis(logits, label[..., None], axis=-1)[..., 0]
    class_loss = jnp.sum(jnp.where(obj, lse - picked, 0.0)) / n_obj

    return 10.0 * box_loss + 1.0 * object_loss + 10.0 * no_object_loss + 1.0 * class_loss


if __name__ == "__main__":
    key = jax.random.PRNGKey(0)
    N, A, S, C = 2, 3, 8, 4
    k1, k2, k3, k4, k5 = jax.random.split(key, 5)

    predictions = jax.random.normal(k1, (N, A, S, S, 5 + C), jnp.float32)
    obj = (jax.random.uniform(k2, (N, A, S, S)) < 0.3).astype(jnp.float32)
    xy = jax.random.uniform(k3, (N, A, S, S, 2), minval=0.05, maxval=0.95)
    wh = jax.random.uniform(k4, (N, A, S, S, 2), minval=0.1, maxval=2.0)
    cls = jax.random.randint(k5, (N, A, S, S, 1), 0, C).astype(jnp.float32)
    target = jnp.concatenate([obj[..., None], xy, wh, cls], axis=-1)
    anchors = jnp.array([[0.28, 0.22], [0.38, 0.48], [0.90, 0.78]], jnp.float32)

    # jit so the pack can actually fuse into the pallas_call input DMA
    loss = jax.block_until_ready(jax.jit(yolo_loss)(predictions, target, anchors))
    ref = yolo_loss_ref(predictions, target, anchors)

    assert bool(jnp.isfinite(loss)), "kernel produced non-finite loss"
    assert jnp.allclose(loss, ref, rtol=1e-4, atol=1e-4), (float(loss), float(ref))
    print("KERNEL_OK")
</pallas_src>

<mosaic_0001>
module attributes {stable_mosaic.version = 11 : i64} {
  func.func @kernel(%arg0: i32, %arg1: i32, %arg2: i32, %arg3: memref<1x4x8x128xf32, #tpu.memory_space<vmem>>, %arg4: memref<1x15x8x128xf32, #tpu.memory_space<vmem>>, %arg5: memref<1x4x8x128xf32, #tpu.memory_space<vmem>>) attributes {dimension_semantics = [#tpu.dimension_semantics<parallel>, #tpu.dimension_semantics<arbitrary>, #tpu.dimension_semantics<arbitrary>], iteration_bounds = array<i64: 2, 3, 1>, scalar_prefetch = 0 : i64, scratch_operands = 0 : i64, tpu.core_type = #tpu.core_type<tc>, window_params = [{transform_indices = @transform_0, window_bounds = array<i64: 1, 4, 8, 128>}, {transform_indices = @transform_1, window_bounds = array<i64: 1, 15, 8, 128>}, {transform_indices = @transform_2, window_bounds = array<i64: 1, 4, 8, 128>}]} {
    %c0_i32 = arith.constant 0 : i32
    %0 = arith.cmpi eq, %arg1, %c0_i32 : i32
    %c0_i32_0 = arith.constant 0 : i32
    %1 = arith.cmpi eq, %arg2, %c0_i32_0 : i32
    %2 = arith.andi %0, %1 : i1
    %3 = arith.extui %2 : i1 to i32
    %c0_i32_1 = arith.constant 0 : i32
    %4 = arith.cmpi ne, %3, %c0_i32_1 : i32
    scf.if %4 {
      %cst_104 = arith.constant 0.000000e+00 : f32
      %217 = vector.broadcast %cst_104 : f32 to vector<1x4x8x128xf32>
      %c0_105 = arith.constant 0 : index
      %c0_106 = arith.constant 0 : index
      %c0_107 = arith.constant 0 : index
      %c0_108 = arith.constant 0 : index
      %218 = vector.load %arg5[%c0_105, %c0_106, %c0_107, %c0_108] : memref<1x4x8x128xf32, #tpu.memory_space<vmem>>, vector<1x4x8x128xf32>
      tpu.vector_store %arg5[%c0_105, %c0_106, %c0_107, %c0_108], %217 {strides = array<i32>} : memref<1x4x8x128xf32, #tpu.memory_space<vmem>>, vector<1x4x8x128xf32>,
    } else {
    }
    %c0 = arith.constant 0 : index
    %c0_2 = arith.constant 0 : index
    %c0_3 = arith.constant 0 : index
    %c0_4 = arith.constant 0 : index
    %5 = vector.load %arg3[%c0, %c0_2, %c0_3, %c0_4] : memref<1x4x8x128xf32, #tpu.memory_space<vmem>>, vector<1x1x8x128xf32>
    %6 = vector.shape_cast %5 : vector<1x1x8x128xf32> to vector<8x128xf32>
    %c0_5 = arith.constant 0 : index
    %c1 = arith.constant 1 : index
    %c0_6 = arith.constant 0 : index
    %c0_7 = arith.constant 0 : index
    %7 = vector.load %arg3[%c0_5, %c1, %c0_6, %c0_7] : memref<1x4x8x128xf32, #tpu.memory_space<vmem>>, vector<1x1x8x128xf32>
    %8 = vector.shape_cast %7 : vector<1x1x8x128xf32> to vector<8x128xf32>
    %c0_8 = arith.constant 0 : index
    %c2 = arith.constant 2 : index
    %c0_9 = arith.constant 0 : index
    %c0_10 = arith.constant 0 : index
    %9 = vector.load %arg3[%c0_8, %c2, %c0_9, %c0_10] : memref<1x4x8x128xf32, #tpu.memory_space<vmem>>, vector<1x1x8x128xf32>
    %10 = vector.shape_cast %9 : vector<1x1x8x128xf32> to vector<8x128xf32>
    %c0_11 = arith.constant 0 : index
    %c3 = arith.constant 3 : index
    %c0_12 = arith.constant 0 : index
    %c0_13 = arith.constant 0 : index
    %11 = vector.load %arg3[%c0_11, %c3, %c0_12, %c0_13] : memref<1x4x8x128xf32, #tpu.memory_space<vmem>>, vector<1x1x8x128xf32>
    %12 = vector.shape_cast %11 : vector<1x1x8x128xf32> to vector<8x128xf32>
    %cst = arith.constant 0.000000e+00 : f32
    %13 = vector.broadcast %cst : f32 to vector<8x128xf32>
    %c0_i32_14 = arith.constant 0 : i32
    %c8_i32 = arith.constant 8 : i32
    %14 = arith.muli %c0_i32_14, %c8_i32 : i32
    %15 = tpu.assume_multiple %14, 8 : i32
    %c0_15 = arith.constant 0 : index
    %c0_16 = arith.constant 0 : index
    %16 = arith.index_cast %15 : i32 to index
    %c0_17 = arith.constant 0 : index
    %17 = vector.load %arg4[%c0_15, %c0_16, %16, %c0_17] : memref<1x15x8x128xf32, #tpu.memory_space<vmem>>, vector<1x1x8x128xf32>
    %18 = vector.shape_cast %17 : vector<1x1x8x128xf32> to vector<8x128xf32>
    %c0_18 = arith.constant 0 : index
    %c1_19 = arith.constant 1 : index
    %19 = arith.index_cast %15 : i32 to index
    %c0_20 = arith.constant 0 : index
    %20 = vector.load %arg4[%c0_18, %c1_19, %19, %c0_20] : memref<1x15x8x128xf32, #tpu.memory_space<vmem>>, vector<1x1x8x128xf32>
    %21 = vector.shape_cast %20 : vector<1x1x8x128xf32> to vector<8x128xf32>
    %c0_21 = arith.constant 0 : index
    %c2_22 = arith.constant 2 : index
    %22 = arith.index_cast %15 : i32 to index
    %c0_23 = arith.constant 0 : index
    %23 = vector.load %arg4[%c0_21, %c2_22, %22, %c0_23] : memref<1x15x8x128xf32, #tpu.memory_space<vmem>>, vector<1x1x8x128xf32>
    %24 = vector.shape_cast %23 : vector<1x1x8x128xf32> to vector<8x128xf32>
    %c0_24 = arith.constant 0 : index
    %c3_25 = arith.constant 3 : index
    %25 = arith.index_cast %15 : i32 to index
    %c0_26 = arith.constant 0 : index
    %26 = vector.load %arg4[%c0_24, %c3_25, %25, %c0_26] : memref<1x15x8x128xf32, #tpu.memory_space<vmem>>, vector<1x1x8x128xf32>
    %27 = vector.shape_cast %26 : vector<1x1x8x128xf32> to vector<8x128xf32>
    %c0_27 = arith.constant 0 : index
    %c4 = arith.constant 4 : index
    %28 = arith.index_cast %15 : i32 to index
    %c0_28 = arith.constant 0 : index
    %29 = vector.load %arg4[%c0_27, %c4, %28, %c0_28] : memref<1x15x8x128xf32, #tpu.memory_space<vmem>>, vector<1x1x8x128xf32>
    %30 = vector.shape_cast %29 : vector<1x1x8x128xf32> to vector<8x128xf32>
    %c0_29 = arith.constant 0 : index
    %c9 = arith.constant 9 : index
    %31 = arith.index_cast %15 : i32 to index
    %c0_30 = arith.constant 0 : index
    %32 = vector.load %arg4[%c0_29, %c9, %31, %c0_30] : memref<1x15x8x128xf32, #tpu.memory_space<vmem>>, vector<1x1x8x128xf32>
    %33 = vector.shape_cast %32 : vector<1x1x8x128xf32> to vector<8x128xf32>
    %c0_31 = arith.constant 0 : index
    %c10 = arith.constant 10 : index
    %34 = arith.index_cast %15 : i32 to index
    %c0_32 = arith.constant 0 : index
    %35 = vector.load %arg4[%c0_31, %c10, %34, %c0_32] : memref<1x15x8x128xf32, #tpu.memory_space<vmem>>, vector<1x1x8x128xf32>
    %36 = vector.shape_cast %35 : vector<1x1x8x128xf32> to vector<8x128xf32>
    %c0_33 = arith.constant 0 : index
    %c11 = arith.constant 11 : index
    %37 = arith.index_cast %15 : i32 to index
    %c0_34 = arith.constant 0 : index
    %38 = vector.load %arg4[%c0_33, %c11, %37, %c0_34] : memref<1x15x8x128xf32, #tpu.memory_space<vmem>>, vector<1x1x8x128xf32>
    %39 = vector.shape_cast %38 : vector<1x1x8x128xf32> to vector<8x128xf32>
    %c0_35 = arith.constant 0 : index
    %c12 = arith.constant 12 : index
    %40 = arith.index_cast %15 : i32 to index
    %c0_36 = arith.constant 0 : index
    %41 = vector.load %arg4[%c0_35, %c12, %40, %c0_36] : memref<1x15x8x128xf32, #tpu.memory_space<vmem>>, vector<1x1x8x128xf32>
    %42 = vector.shape_cast %41 : vector<1x1x8x128xf32> to vector<8x128xf32>
    %c0_37 = arith.constant 0 : index
    %c13 = arith.constant 13 : index
    %43 = arith.index_cast %15 : i32 to index
    %c0_38 = arith.constant 0 : index
    %44 = vector.load %arg4[%c0_37, %c13, %43, %c0_38] : memref<1x15x8x128xf32, #tpu.memory_space<vmem>>, vector<1x1x8x128xf32>
    %45 = vector.shape_cast %44 : vector<1x1x8x128xf32> to vector<8x128xf32>
    %c0_39 = arith.constant 0 : index
    %c14 = arith.constant 14 : index
    %46 = arith.index_cast %15 : i32 to index
    %c0_40 = arith.constant 0 : index
    %47 = vector.load %arg4[%c0_39, %c14, %46, %c0_40] : memref<1x15x8x128xf32, #tpu.memory_space<vmem>>, vector<1x1x8x128xf32>
    %48 = vector.shape_cast %47 : vector<1x1x8x128xf32> to vector<8x128xf32>
    %cst_41 = arith.constant 0.000000e+00 : f32
    %49 = vector.broadcast %cst_41 : f32 to vector<8x128xf32>
    %cst_42 = arith.constant 1.000000e+00 : f32
    %50 = vector.broadcast %cst_42 : f32 to vector<8x128xf32>
    %cst_43 = arith.constant 1.000000e+00 : f32
    %51 = vector.broadcast %cst_43 : f32 to vector<8x128xf32>
    %52 = arith.cmpf oeq, %48, %51 : vector<8x128xf32>
    %cst_44 = arith.constant 0.000000e+00 : f32
    %53 = vector.broadcast %cst_44 : f32 to vector<8x128xf32>
    %54 = arith.cmpf oeq, %48, %53 : vector<8x128xf32>
    %55 = arith.select %52, %50, %49 : vector<8x128xi1>, vector<8x128xf32>
    %56 = arith.addf %13, %55 : vector<8x128xf32>
    %57 = arith.select %54, %50, %49 : vector<8x128xi1>, vector<8x128xf32>
    %58 = arith.addf %13, %57 : vector<8x128xf32>
    %cst_45 = arith.constant 0.000000e+00 : f32
    %59 = vector.broadcast %cst_45 : f32 to vector<8x128xf32>
    %60 = arith.maximumf %18, %59 : vector<8x128xf32>
    %61 = math.absf %18 : vector<8x128xf32>
    %cst_46 = arith.constant 0.000000e+00 : f32
    %62 = vector.broadcast %cst_46 : f32 to vector<8x128xf32>
    %63 = arith.subf %62, %61 : vector<8x128xf32>
    %64 = math.exp %63 : vector<8x128xf32>
    %65 = math.log1p %64 : vector<8x128xf32>
    %66 = arith.addf %60, %65 : vector<8x128xf32>
    %67 = arith.select %54, %66, %49 : vector<8x128xi1>, vector<8x128xf32>
    %68 = arith.addf %13, %67 : vector<8x128xf32>
    %69 = arith.negf %21 : vector<8x128xf32>
    %70 = math.exp %69 : vector<8x128xf32>
    %cst_47 = arith.constant 1.000000e+00 : f32
    %71 = vector.broadcast %cst_47 : f32 to vector<8x128xf32>
    %72 = arith.addf %71, %70 : vector<8x128xf32>
    %73 = arith.divf %71, %72 : vector<8x128xf32>
    %74 = arith.negf %24 : vector<8x128xf32>
    %75 = math.exp %74 : vector<8x128xf32>
    %cst_48 = arith.constant 1.000000e+00 : f32
    %76 = vector.broadcast %cst_48 : f32 to vector<8x128xf32>
    %77 = arith.addf %76, %75 : vector<8x128xf32>
    %78 = arith.divf %76, %77 : vector<8x128xf32>
    %79 = math.exp %27 : vector<8x128xf32>
    %80 = arith.mulf %79, %6 : vector<8x128xf32>
    %81 = math.exp %30 : vector<8x128xf32>
    %82 = arith.mulf %81, %8 : vector<8x128xf32>
    %cst_49 = arith.constant 5.000000e-01 : f32
    %83 = vector.broadcast %cst_49 : f32 to vector<8x128xf32>
    %84 = arith.mulf %83, %80 : vector<8x128xf32>
    %85 = arith.subf %73, %84 : vector<8x128xf32>
    %cst_50 = arith.constant 5.000000e-01 : f32
    %86 = vector.broadcast %cst_50 : f32 to vector<8x128xf32>
    %87 = arith.mulf %86, %80 : vector<8x128xf32>
    %88 = arith.addf %73, %87 : vector<8x128xf32>
    %cst_51 = arith.constant 5.000000e-01 : f32
    %89 = vector.broadcast %cst_51 : f32 to vector<8x128xf32>
    %90 = arith.mulf %89, %82 : vector<8x128xf32>
    %91 = arith.subf %78, %90 : vector<8x128xf32>
    %cst_52 = arith.constant 5.000000e-01 : f32
    %92 = vector.broadcast %cst_52 : f32 to vector<8x128xf32>
    %93 = arith.mulf %92, %82 : vector<8x128xf32>
    %94 = arith.addf %78, %93 : vector<8x128xf32>
    %cst_53 = arith.constant 5.000000e-01 : f32
    %95 = vector.broadcast %cst_53 : f32 to vector<8x128xf32>
    %96 = arith.mulf %95, %39 : vector<8x128xf32>
    %97 = arith.subf %33, %96 : vector<8x128xf32>
    %cst_54 = arith.constant 5.000000e-01 : f32
    %98 = vector.broadcast %cst_54 : f32 to vector<8x128xf32>
    %99 = arith.mulf %98, %39 : vector<8x128xf32>
    %100 = arith.addf %33, %99 : vector<8x128xf32>
    %cst_55 = arith.constant 5.000000e-01 : f32
    %101 = vector.broadcast %cst_55 : f32 to vector<8x128xf32>
    %102 = arith.mulf %101, %42 : vector<8x128xf32>
    %103 = arith.subf %36, %102 : vector<8x128xf32>
    %cst_56 = arith.constant 5.000000e-01 : f32
    %104 = vector.broadcast %cst_56 : f32 to vector<8x128xf32>
    %105 = arith.mulf %104, %42 : vector<8x128xf32>
    %106 = arith.addf %36, %105 : vector<8x128xf32>
    %107 = arith.minimumf %88, %100 : vector<8x128xf32>
    %108 = arith.maximumf %85, %97 : vector<8x128xf32>
    %109 = arith.subf %107, %108 : vector<8x128xf32>
    %cst_57 = arith.constant 0.000000e+00 : f32
    %110 = vector.broadcast %cst_57 : f32 to vector<8x128xf32>
    %111 = arith.maximumf %109, %110 : vector<8x128xf32>
    %112 = arith.minimumf %94, %106 : vector<8x128xf32>
    %113 = arith.maximumf %91, %103 : vector<8x128xf32>
    %114 = arith.subf %112, %113 : vector<8x128xf32>
    %cst_58 = arith.constant 0.000000e+00 : f32
    %115 = vector.broadcast %cst_58 : f32 to vector<8x128xf32>
    %116 = arith.maximumf %114, %115 : vector<8x128xf32>
    %117 = arith.mulf %111, %116 : vector<8x128xf32>
    %118 = arith.subf %88, %85 : vector<8x128xf32>
    %119 = arith.subf %94, %91 : vector<8x128xf32>
    %120 = arith.mulf %118, %119 : vector<8x128xf32>
    %121 = math.absf %120 : vector<8x128xf32>
    %122 = arith.subf %100, %97 : vector<8x128xf32>
    %123 = arith.subf %106, %103 : vector<8x128xf32>
    %124 = arith.mulf %122, %123 : vector<8x128xf32>
    %125 = math.absf %124 : vector<8x128xf32>
    %126 = arith.addf %121, %125 : vector<8x128xf32>
    %127 = arith.subf %126, %117 : vector<8x128xf32>
    %cst_59 = arith.constant 9.99999997E-7 : f32
    %128 = vector.broadcast %cst_59 : f32 to vector<8x128xf32>
    %129 = arith.addf %127, %128 : vector<8x128xf32>
    %130 = arith.divf %117, %129 : vector<8x128xf32>
    %131 = arith.negf %18 : vector<8x128xf32>
    %132 = math.exp %131 : vector<8x128xf32>
    %cst_60 = arith.constant 1.000000e+00 : f32
    %133 = vector.broadcast %cst_60 : f32 to vector<8x128xf32>
    %134 = arith.addf %133, %132 : vector<8x128xf32>
    %135 = arith.divf %133, %134 : vector<8x128xf32>
    %136 = arith.mulf %130, %48 : vector<8x128xf32>
    %137 = arith.subf %135, %136 : vector<8x128xf32>
    %138 = arith.mulf %137, %137 : vector<8x128xf32>
    %139 = arith.mulf %39, %10 : vector<8x128xf32>
    %cst_61 = arith.constant 1.000000e-16 : f32
    %140 = vector.broadcast %cst_61 : f32 to vector<8x128xf32>
    %141 = arith.addf %140, %139 : vector<8x128xf32>
    %142 = math.log %141 : vector<8x128xf32>
    %143 = arith.mulf %42, %12 : vector<8x128xf32>
    %cst_62 = arith.constant 1.000000e-16 : f32
    %144 = vector.broadcast %cst_62 : f32 to vector<8x128xf32>
    %145 = arith.addf %144, %143 : vector<8x128xf32>
    %146 = math.log %145 : vector<8x128xf32>
    %147 = arith.subf %73, %33 : vector<8x128xf32>
    %148 = arith.mulf %147, %147 : vector<8x128xf32>
    %149 = arith.subf %78, %36 : vector<8x128xf32>
    %150 = arith.mulf %149, %149 : vector<8x128xf32>
    %151 = arith.addf %148, %150 : vector<8x128xf32>
    %152 = arith.subf %27, %142 : vector<8x128xf32>
    %153 = arith.mulf %152, %152 : vector<8x128xf32>
    %154 = arith.addf %151, %153 : vector<8x128xf32>
    %155 = arith.subf %30, %146 : vector<8x128xf32>
    %156 = arith.mulf %155, %155 : vector<8x128xf32>
    %157 = arith.addf %154, %156 : vector<8x128xf32>
    %c0_63 = arith.constant 0 : index
    %c5 = arith.constant 5 : index
    %158 = arith.index_cast %15 : i32 to index
    %c0_64 = arith.constant 0 : index
    %159 = vector.load %arg4[%c0_63, %c5, %158, %c0_64] : memref<1x15x8x128xf32, #tpu.memory_space<vmem>>, vector<1x1x8x128xf32>
    %160 = vector.shape_cast %159 : vector<1x1x8x128xf32> to vector<8x128xf32>
    %c0_65 = arith.constant 0 : index
    %c6 = arith.constant 6 : index
    %161 = arith.index_cast %15 : i32 to index
    %c0_66 = arith.constant 0 : index
    %162 = vector.load %arg4[%c0_65, %c6, %161, %c0_66] : memref<1x15x8x128xf32, #tpu.memory_space<vmem>>, vector<1x1x8x128xf32>
    %163 = vector.shape_cast %162 : vector<1x1x8x128xf32> to vector<8x128xf32>
    %c0_67 = arith.constant 0 : index
    %c7 = arith.constant 7 : index
    %164 = arith.index_cast %15 : i32 to index
    %c0_68 = arith.constant 0 : index
    %165 = vector.load %arg4[%c0_67, %c7, %164, %c0_68] : memref<1x15x8x128xf32, #tpu.memory_space<vmem>>, vector<1x1x8x128xf32>
    %166 = vector.shape_cast %165 : vector<1x1x8x128xf32> to vector<8x128xf32>
    %c0_69 = arith.constant 0 : index
    %c8 = arith.constant 8 : index
    %167 = arith.index_cast %15 : i32 to index
    %c0_70 = arith.constant 0 : index
    %168 = vector.load %arg4[%c0_69, %c8, %167, %c0_70] : memref<1x15x8x128xf32, #tpu.memory_space<vmem>>, vector<1x1x8x128xf32>
    %169 = vector.shape_cast %168 : vector<1x1x8x128xf32> to vector<8x128xf32>
    %170 = arith.maximumf %160, %163 : vector<8x128xf32>
    %171 = arith.maximumf %170, %166 : vector<8x128xf32>
    %172 = arith.maximumf %171, %169 : vector<8x128xf32>
    %173 = arith.subf %160, %172 : vector<8x128xf32>
    %174 = math.exp %173 : vector<8x128xf32>
    %175 = arith.subf %163, %172 : vector<8x128xf32>
    %176 = math.exp %175 : vector<8x128xf32>
    %177 = arith.addf %174, %176 : vector<8x128xf32>
    %178 = arith.subf %166, %172 : vector<8x128xf32>
    %179 = math.exp %178 : vector<8x128xf32>
    %180 = arith.addf %177, %179 : vector<8x128xf32>
    %181 = arith.subf %169, %172 : vector<8x128xf32>
    %182 = math.exp %181 : vector<8x128xf32>
    %183 = arith.addf %180, %182 : vector<8x128xf32>
    %184 = math.log %183 : vector<8x128xf32>
    %185 = arith.addf %172, %184 : vector<8x128xf32>
    %186 = arith.subf %185, %45 : vector<8x128xf32>
    %cst_71 = arith.constant 2.500000e+00 : f32
    %187 = vector.broadcast %cst_71 : f32 to vector<8x128xf32>
    %188 = arith.mulf %187, %157 : vector<8x128xf32>
    %189 = arith.addf %188, %138 : vector<8x128xf32>
    %190 = arith.addf %189, %186 : vector<8x128xf32>
    %191 = arith.select %52, %190, %49 : vector<8x128xi1>, vector<8x128xf32>
    %192 = arith.addf %13, %191 : vector<8x128xf32>
    %c1_i32 = arith.constant 1 : i32
    %c0_72 = arith.constant 0 : index
    %c0_73 = arith.constant 0 : index
    %c0_74 = arith.constant 0 : index
    %c0_75 = arith.constant 0 : index
    %193 = vector.load %arg5[%c0_72, %c0_73, %c0_74, %c0_75] : memref<1x4x8x128xf32, #tpu.memory_space<vmem>>, vector<1x1x8x128xf32>
    %194 = vector.shape_cast %193 : vector<1x1x8x128xf32> to vector<8x128xf32>
    %195 = arith.addf %194, %192 : vector<8x128xf32>
    %c0_76 = arith.constant 0 : index
    %c0_77 = arith.constant 0 : index
    %c0_78 = arith.constant 0 : index
    %c0_79 = arith.constant 0 : index
    %196 = vector.load %arg5[%c0_76, %c0_77, %c0_78, %c0_79] : memref<1x4x8x128xf32, #tpu.memory_space<vmem>>, vector<1x1x8x128xf32>
    %197 = vector.shape_cast %196 : vector<1x1x8x128xf32> to vector<8x128xf32>
    %198 = vector.shape_cast %195 : vector<8x128xf32> to vector<1x1x8x128xf32>
    tpu.vector_store %arg5[%c0_76, %c0_77, %c0_78, %c0_79], %198 {strides = array<i32>} : memref<1x4x8x128xf32, #tpu.memory_space<vmem>>, vector<1x1x8x128xf32>,
    %c0_80 = arith.constant 0 : index
    %c1_81 = arith.constant 1 : index
    %c0_82 = arith.constant 0 : index
    %c0_83 = arith.constant 0 : index
    %199 = vector.load %arg5[%c0_80, %c1_81, %c0_82, %c0_83] : memref<1x4x8x128xf32, #tpu.memory_space<vmem>>, vector<1x1x8x128xf32>
    %200 = vector.shape_cast %199 : vector<1x1x8x128xf32> to vector<8x128xf32>
    %201 = arith.addf %200, %68 : vector<8x128xf32>
    %c0_84 = arith.constant 0 : index
    %c1_85 = arith.constant 1 : index
    %c0_86 = arith.constant 0 : index
    %c0_87 = arith.constant 0 : index
    %202 = vector.load %arg5[%c0_84, %c1_85, %c0_86, %c0_87] : memref<1x4x8x128xf32, #tpu.memory_space<vmem>>, vector<1x1x8x128xf32>
    %203 = vector.shape_cast %202 : vector<1x1x8x128xf32> to vector<8x128xf32>
    %204 = vector.shape_cast %201 : vector<8x128xf32> to vector<1x1x8x128xf32>
    tpu.vector_store %arg5[%c0_84, %c1_85, %c0_86, %c0_87], %204 {strides = array<i32>} : memref<1x4x8x128xf32, #tpu.memory_space<vmem>>, vector<1x1x8x128xf32>,
    %c0_88 = arith.constant 0 : index
    %c2_89 = arith.constant 2 : index
    %c0_90 = arith.constant 0 : index
    %c0_91 = arith.constant 0 : index
    %205 = vector.load %arg5[%c0_88, %c2_89, %c0_90, %c0_91] : memref<1x4x8x128xf32, #tpu.memory_space<vmem>>, vector<1x1x8x128xf32>
    %206 = vector.shape_cast %205 : vector<1x1x8x128xf32> to vector<8x128xf32>
    %207 = arith.addf %206, %56 : vector<8x128xf32>
    %c0_92 = arith.constant 0 : index
    %c2_93 = arith.constant 2 : index
    %c0_94 = arith.constant 0 : index
    %c0_95 = arith.constant 0 : index
    %208 = vector.load %arg5[%c0_92, %c2_93, %c0_94, %c0_95] : memref<1x4x8x128xf32, #tpu.memory_space<vmem>>, vector<1x1x8x128xf32>
    %209 = vector.shape_cast %208 : vector<1x1x8x128xf32> to vector<8x128xf32>
    %210 = vector.shape_cast %207 : vector<8x128xf32> to vector<1x1x8x128xf32>
    tpu.vector_store %arg5[%c0_92, %c2_93, %c0_94, %c0_95], %210 {strides = array<i32>} : memref<1x4x8x128xf32, #tpu.memory_space<vmem>>, vector<1x1x8x128xf32>,
    %c0_96 = arith.constant 0 : index
    %c3_97 = arith.constant 3 : index
    %c0_98 = arith.constant 0 : index
    %c0_99 = arith.constant 0 : index
    %211 = vector.load %arg5[%c0_96, %c3_97, %c0_98, %c0_99] : memref<1x4x8x128xf32, #tpu.memory_space<vmem>>, vector<1x1x8x128xf32>
    %212 = vector.shape_cast %211 : vector<1x1x8x128xf32> to vector<8x128xf32>
    %213 = arith.addf %212, %58 : vector<8x128xf32>
    %c0_100 = arith.constant 0 : index
    %c3_101 = arith.constant 3 : index
    %c0_102 = arith.constant 0 : index
    %c0_103 = arith.constant 0 : index
    %214 = vector.load %arg5[%c0_100, %c3_101, %c0_102, %c0_103] : memref<1x4x8x128xf32, #tpu.memory_space<vmem>>, vector<1x1x8x128xf32>
    %215 = vector.shape_cast %214 : vector<1x1x8x128xf32> to vector<8x128xf32>
    %216 = vector.shape_cast %213 : vector<8x128xf32> to vector<1x1x8x128xf32>
    tpu.vector_store %arg5[%c0_100, %c3_101, %c0_102, %c0_103], %216 {strides = array<i32>} : memref<1x4x8x128xf32, #tpu.memory_space<vmem>>, vector<1x1x8x128xf32>,
    return
  }
  func.func @transform_0(%arg0: i32, %arg1: i32, %arg2: i32) -> (i32, i32, i32, i32) {
    %c0_i32 = arith.constant 0 : i32
    %c0_i32_0 = arith.constant 0 : i32
    %c0_i32_1 = arith.constant 0 : i32
    %c0_i32_2 = arith.constant 0 : i32
    return %arg1, %c0_i32, %c0_i32_0, %c0_i32_1 : i32, i32, i32, i32
  }
  func.func @transform_1(%arg0: i32, %arg1: i32, %arg2: i32) -> (i32, i32, i32, i32) {
    %c1_i32 = arith.constant 1 : i32
    %0 = arith.muli %arg0, %c1_i32 : i32
    %1 = arith.addi %0, %arg2 : i32
    %c0_i32 = arith.constant 0 : i32
    %c0_i32_0 = arith.constant 0 : i32
    %c0_i32_1 = arith.constant 0 : i32
    return %arg1, %c0_i32, %1, %c0_i32_0 : i32, i32, i32, i32
  }
  func.func @transform_2(%arg0: i32, %arg1: i32, %arg2: i32) -> (i32, i32, i32, i32) {
    %c0_i32 = arith.constant 0 : i32
    %c0_i32_0 = arith.constant 0 : i32
    %c0_i32_1 = arith.constant 0 : i32
    %c0_i32_2 = arith.constant 0 : i32
    return %arg0, %c0_i32, %c0_i32_0, %c0_i32_1 : i32, i32, i32, i32
  }
}

</mosaic_0001>

<bundles_post_ra>
// kernel: yolo_loss.1
= control target key start
LH: loop header
LB: loop body
LE: loop exit
PB: predicated region body
PF: predicated region fallthrough
CT: control target
= control target key end

     0   :  { %s855_s9 = smov 0   ;;  %s857_s10 = smov 0   ;;  %s1119_s0 = inlined_call_operand.vmem [shape: f32[3,4,8,128], index: 0, kind: input, shape index: {}]   ;;  %s1120_s1 = inlined_call_operand.vmem [shape: f32[3,15,16,128], index: 1, kind: input, shape index: {}]   ;;  %s1121_s2 = inlined_call_operand.vmem [shape: f32[2,4,8,128], index: 2, kind: output, shape index: {}]  }
   0x1   :  { %s859_s11 = smov 0   ;;  %s861_s12 = smov 0  }
   0x2   :  { %s863_s13 = smov 0   ;;  %s865_s14 = smov 0  }
   0x3   :  { %s867_s15 = smov 0  }
   0x4 LB: > { %s27_s16 = sadd.s32 1, %s828_s13  ;;  %s31_s17 = sadd.s32 1, %s832_s14  ;;  %s836_s15 = sphi %s867_s15, %s12_s15   ;;  %s832_s14 = sphi %s865_s14, %s1135_s14   ;;  %s828_s13 = sphi %s863_s13, %s1134_s13   ;;  %s824_s12 = sphi %s861_s12, %s1133_s12   ;;  %s820_s11 = sphi %s859_s11, %s1132_s11   ;;  %s816_s10 = sphi %s857_s10, %s1131_s10   ;;  %s812_s9 = sphi %s855_s9, %s1130_s9  }
   0x5   : > { %p29_p0 = scmp.ge.s32.totalorder %s27_s16, 3  ;;  %p75_p1 = scmp.ne.s32.totalorder %s816_s10, %s812_s9 }
   0x6   : > { %p76_p2 = scmp.eq.s32.totalorder %s836_s15, 0  ;;  %s68_s21 = sadd.s32 1, %s816_s10 }
   0x7   : > { %s1137_s16 = smov (%p29_p0, %s27_s16), 0  ;;  %s1139_s17 = smov (!%p29_p0, %s31_s17), %s832_s14 }
   0x8   : > { %p77_p3 = por %p76_p2, %p75_p1  ;;  %p33_p4 = scmp.ge.s32.totalorder %s1139_s17, 2 }
   0x9   : > { %s63_s18 = ssub.s32 %s828_s13, %s1137_s16  ;;  %p646_p6 = scmp.ge.s32.totalorder %s836_s15, 6 }
   0xa   : > { %s1141_s17 = smov (%p33_p4, %s1139_s17), 0 }
   0xb   : > { %s64_s19 = ssub.s32 %s832_s14, %s1141_s17  ;;  %127 = sbr.rel (%p646_p6) target bundleno = 38 (0x26), region = 16 }
   0xc   : > { %s65_s20 = sor.u32 %s64_s19, %s63_s18 }
   0xd   : > { %p66_p5 = scmp.eq.s32.totalorder %s65_s20, 0 }
   0xf   : > { %s906_s22 = scalar_select %p66_p5, %s816_s10, %s68_s21  }
  0x10   : > { %138 = sbr.rel (!%p77_p3) target bundleno = 38 (0x26), region = 24  ;;  %s140_s23 = sand.u32 (%p77_p3), 1, %s816_s10  }
  0x11   : > { %s686_s24 = smul.u32 (%p77_p3), 30, %s828_s13 }
  0x12   : > { %s685_s25 = smul.u32 (%p77_p3), 120, %s140_s23 }
  0x13   : > { %s145_s26 = sadd.s32 (%p77_p3), %s832_s14, %s686_s24 }
  0x14   : > { %s647_s27 = sshll.u32 (%p77_p3), %s145_s26, 3  ;;  %s142_s3 = scalar_lea.vmem (%p77_p3), [#allocation2], %s685_s25 }
  0x15   : > { %s147_s30 = scalar_lea.vmem %s1120_s1, %s647_s27 }
  0x16   : > { %v204_v0 = vld [vmem:[%s147_s30] sm:$0xff]  ;;  %v206_v1 = vld [vmem:[%s147_s30 + $0x10] sm:$0xff] }
  0x17   : > { %v208_v2 = vld [vmem:[%s147_s30 + $0x20] sm:$0xff]  ;;  %205 = vst [vmem:[%s142_s3] sm:$0xff] %v204_v0  ;;  %v210_v3 = vld [vmem:[%s147_s30 + $0x30] sm:$0xff] }
  0x18   : > { %207 = vst [vmem:[%s142_s3 + $0x8] sm:$0xff] %v206_v1  ;;  %v212_v4 = vld [vmem:[%s147_s30 + $0x40] sm:$0xff]  ;;  %v214_v5 = vld [vmem:[%s147_s30 + $0x50] sm:$0xff] }
  0x19   : > { %209 = vst [vmem:[%s142_s3 + $0x10] sm:$0xff] %v208_v2  ;;  %v216_v6 = vld [vmem:[%s147_s30 + $0x60] sm:$0xff]  ;;  %v218_v7 = vld [vmem:[%s147_s30 + $0x70] sm:$0xff] }
  0x1a   : > { %211 = vst [vmem:[%s142_s3 + $0x18] sm:$0xff] %v210_v3  ;;  %v220_v8 = vld [vmem:[%s147_s30 + $0x80] sm:$0xff]  ;;  %v222_v9 = vld [vmem:[%s147_s30 + $0x90] sm:$0xff] }
  0x1b   : > { %213 = vst [vmem:[%s142_s3 + $0x20] sm:$0xff] %v212_v4  ;;  %v224_v10 = vld [vmem:[%s147_s30 + $0xa0] sm:$0xff]  ;;  %v226_v11 = vld [vmem:[%s147_s30 + $0xb0] sm:$0xff] }
  0x1c   : > { %215 = vst [vmem:[%s142_s3 + $0x28] sm:$0xff] %v214_v5  ;;  %v228_v12 = vld [vmem:[%s147_s30 + $0xc0] sm:$0xff]  ;;  %v230_v13 = vld [vmem:[%s147_s30 + $0xd0] sm:$0xff] }
  0x1d   : > { %217 = vst [vmem:[%s142_s3 + $0x30] sm:$0xff] %v216_v6  ;;  %v232_v14 = vld [vmem:[%s147_s30 + $0xe0] sm:$0xff] }
  0x1e   : > { %219 = vst [vmem:[%s142_s3 + $0x38] sm:$0xff] %v218_v7 }
  0x1f   : > { %221 = vst [vmem:[%s142_s3 + $0x40] sm:$0xff] %v220_v8 }
  0x20   : > { %223 = vst [vmem:[%s142_s3 + $0x48] sm:$0xff] %v222_v9 }
  0x21   : > { %225 = vst [vmem:[%s142_s3 + $0x50] sm:$0xff] %v224_v10 }
  0x22   : > { %227 = vst [vmem:[%s142_s3 + $0x58] sm:$0xff] %v226_v11 }
  0x23   : > { %229 = vst [vmem:[%s142_s3 + $0x60] sm:$0xff] %v228_v12 }
  0x24   : > { %231 = vst [vmem:[%s142_s3 + $0x68] sm:$0xff] %v230_v13 }
  0x25   : > { %233 = vst [vmem:[%s142_s3 + $0x70] sm:$0xff] %v232_v14 }
  0x26 PF: > { %p648_p7 = scmp.ge.s32.totalorder %s836_s15, 1  ;;  %p238_p8 = scmp.lt.s32.totalorder %s836_s15, 7 }
  0x28   : > { %p239_p9 = pnand %p648_p7, %p238_p8 }
  0x29   : > { %s245_s4 = sand.u32 (!%p239_p9), 1, %s812_s9   ;;  %p271_p10 = scmp.lt.s32.totalorder (!%p239_p9), %s820_s11, 2 }
  0x2a   : > { %242 = sbr.rel (%p239_p9) target bundleno = 132 (0x84), region = 62  ;;  %p277_p11 = scmp.lt.s32.totalorder (!%p239_p9), %s824_s12, 1 }
  0x2b   : > { %s687_s5 = smul.u32 (!%p239_p9), 120, %s245_s4  ;;  %p282_p12 = scmp.eq.s32.totalorder (!%p239_p9), %s820_s11, 0 }
  0x2d   : > { %s933_s25 = scalar_lea.vmem (!%p239_p9), [#allocation2], %s687_s5 }
  0x2f   : > { %s272_s6 = scalar_select %p271_p10, %s820_s11, 2  ;;  %v838_v15 = vmov (%p282_p12), 0.0  }
  0x30   : > { %s1143_s12 = smov (!%p277_p11, %s824_s12), 1  ;;  %287 = sbr.rel (!%p282_p12) target bundleno = 55 (0x37), region = 70 }
  0x31   : > { %s682_s7 = sshll.u32 %s272_s6, 5  ;;  %s683_s20 = sshll.u32 %s1143_s12, 5 }
  0x32   : > { %s925_s19 = scalar_lea.vmem %s1119_s0, %s682_s7  ;;  %s931_s24 = scalar_lea.vmem %s1121_s2, %s683_s20 }
  0x33   : > { %288 = vst [vmem:[%s931_s24] sm:$0xff] (%p282_p12), %v838_v15 }
  0x34   : > { %289 = vst [vmem:[%s931_s24 + $0x8] sm:$0xff] (%p282_p12), %v838_v15 }
  0x35   : > { %290 = vst [vmem:[%s931_s24 + $0x10] sm:$0xff] %v838_v15 }
  0x36   : > { %291 = vst [vmem:[%s931_s24 + $0x18] sm:$0xff] %v838_v15 }
  0x37 PF: > { %v657_v16 = vld [vmem:[%s933_s25 + $0x8] sm:$0xff]  ;;  %v658_v17 = vld [vmem:[%s933_s25 + $0x10] sm:$0xff]  ;;  %v942_v20 = vld [vmem:[%s933_s25 + $0x18] sm:$0xff] }
  0x38   : > { %v667_v18 = vmul.f32 -1.442695, %v657_v16  ;;  %v668_v19 = vmul.f32 -1.442695, %v658_v17  ;;  %v945_v21 = vld [vmem:[%s933_s25 + $0x20] sm:$0xff]  ;;  %v948_v22 = vld [vmem:[%s933_s25 + $0x28] sm:$0xff] }
  0x39   : > { %v951_v23 = vld [vmem:[%s933_s25 + $0x30] sm:$0xff]  ;;  %v954_v24 = vld [vmem:[%s933_s25] sm:$0xff]  ;;  %v391_v26 = vmul.f32 1.442695, %v942_v20  ;;  %v663_v27 = vld [vmem:[%s933_s25 + $0x58] sm:$0xff] }
  0x3a   : > { %746 = vpow2.f32 %v667_v18  ;;  %v337_v25 = vand.u32 2147483647, %v954_v24  ;;  %v394_v28 = vmul.f32 1.442695, %v945_v21  ;;  %v497_v29 = vmax.f32 %v948_v22, %v951_v23  ;;  %v963_v30 = vld [vmem:[%s933_s25 + $0x38] sm:$0xff]  ;;  %v966_v36 = vld [vmem:[%s933_s25 + $0x48] sm:$0xff] }
  0x3b   : > { %748 = vpow2.f32 %v668_v19  ;;  %v403_v35 = vmul.f32 0.5, %v663_v27  ;;  %v969_v37 = vld [vmem:[%s933_s25 + $0x60] sm:$0xff]  ;;  %v669_v41 = vmul.f32 -1.442695, %v954_v24  ;;  %v984_v46 = vld [vmem:[%s933_s25 + $0x50] sm:$0xff] }
  0x3c   : > { %v338_v33 = vsub.f32 0.0, %v337_v25  ;;  %750 = vpow2.f32 %v391_v26  ;;  %v498_v39 = vmax.f32 %v497_v29, %v963_v30  ;;  %v973_v40 = vld [vmem:[%s933_s25 + $0x40] sm:$0xff]  ;;  %v406_v45 = vmul.f32 0.5, %v969_v37  ;;  %v654_v56 = vld [vmem:[%s925_s19 + $0x8] sm:$0xff]  ;;  %v655_v61 = vld [vmem:[%s925_s19 + $0x10] sm:$0xff] }
  0x3d   : > { %752 = vpow2.f32 %v394_v28  ;;  %v977_v43 = vsub.f32 %v966_v36, %v403_v35  ;;  %v980_v44 = vadd.f32 %v966_v36, %v403_v35  ;;  %v292_v51 = vld [vmem:[%s925_s19] sm:$0xff]  ;;  %v466_v10 = vmul.f32 %v663_v27, %v655_v61  ;;  %v656_v12 = vld [vmem:[%s925_s19 + $0x18] sm:$0xff] }
  0x3e   : > { %v339_v42 = vmul.f32 1.442695, %v338_v33  ;;  %v987_v47 = vmax.f32 %v498_v39, %v973_v40  ;;  %v991_v52 = vsub.f32 %v984_v46, %v406_v45  ;;  %v994_v53 = vadd.f32 %v984_v46, %v406_v45 }
  0x3f   : > { %v422_v54 = vsub.f32 %v980_v44, %v977_v43 }
  0x40   : > { %v747_v31 = vpop.eup %746  ;;  %v500_v59 = vsub.f32 %v948_v22, %v987_v47  ;;  %v503_v60 = vsub.f32 %v951_v23, %v987_v47  ;;  %v423_v9 = vsub.f32 %v994_v53, %v991_v52  ;;  %v507_v17 = vsub.f32 %v963_v30, %v987_v47 }
  0x41   : > { %v749_v32 = vpop.eup %748  ;;  %v356_v34 = vadd.f32 1.0, %v747_v31  ;;  %v467_v31 = vadd.f32 1e-16, %v466_v10  ;;  %v470_v30 = vmul.f32 %v969_v37, %v656_v12  ;;  %v839_v12 = vmov 0.0  }
  0x42   : > { %v375_v38 = vadd.f32 1.0, %v749_v32  ;;  %v751_v48 = vpop.eup %750  ;;  %v501_v16 = vmul.f32 1.442695, %v500_v59  ;;  %v504_v25 = vmul.f32 1.442695, %v503_v60  ;;  %v511_v32 = vsub.f32 %v973_v40, %v987_v47 }
  0x43   : > { %754 = vrcp.f32 %v356_v34  ;;  %v753_v49 = vpop.eup %752  ;;  %v366_v58 = vand.u32 2147483647, %v356_v34  ;;  %vm362_vm0 = vweird.f32 %v356_v34  ;;  %v368_v62 = vand.u32 2147483648, %v356_v34 }
  0x44   : > { %756 = vrcp.f32 %v375_v38  ;;  %vm381_vm1 = vweird.f32 %v375_v38  ;;  %v387_v1 = vand.u32 2147483648, %v375_v38  ;;  %v393_v2 = vmul.f32 %v751_v48, %v292_v51 }
  0x45   : > { %758 = vpow2.f32 %v669_v41  ;;  %v385_v4 = vand.u32 2147483647, %v375_v38  ;;  %v396_v5 = vmul.f32 %v753_v49, %v654_v56  ;;  %vm1004_vm4 = vcmp.eq.f32.partialorder %v366_v58, 8.507059e+37 }
  0x46   : > { %760 = vpow2.f32 %v339_v42  ;;  %v369_v14 = vor.u32 1.1754944e-38, %v368_v62  ;;  %v388_v22 = vor.u32 1.1754944e-38, %v387_v1  ;;  %v397_v23 = vmul.f32 0.5, %v393_v2 }
  0x47   : > { %vm386_vm7 = vcmp.eq.f32.partialorder %v385_v4, 8.507059e+37  ;;  %v400_v27 = vmul.f32 0.5, %v396_v5  ;;  %762 = vpow2.f32 %v501_v16  ;;  %v508_v35 = vmul.f32 1.442695, %v507_v17 }
  0x48   : > { %764 = vpow2.f32 %v504_v25  ;;  %v424_v48 = vmul.f32 %v423_v9, %v422_v54  ;;  %v512_v58 = vmul.f32 1.442695, %v511_v32  ;;  %v336_v32 = vmax.f32 %v954_v24, 0.0 }
  0x49   : > { %v755_v50 = vpop.eup %754 }
  0x4a   : > { %v757_v55 = vpop.eup %756  ;;  %v358_v57 = vmul.f32 %v755_v50, %v356_v34  ;;  %vm363_vm2 = vweird.f32 %v755_v50  ;;  %v425_v61 = vand.u32 2147483647, %v424_v48  ;;  %v674_v48 = vld [vmem:[%s931_s24 + $0x8] sm:$0xff] }
  0x4b   : > { %v377_v63 = vmul.f32 %v757_v55, %v375_v38  ;;  %vm382_vm3 = vweird.f32 %v757_v55  ;;  %v759_v6 = vpop.eup %758  ;;  %vm1014_vm5 = vmor %vm362_vm0, %vm363_vm2 }
  0x4c   : > { %v359_v0 = vsub.f32 1.0, %v358_v57  ;;  %v1010_v11 = vpop.eup %760  ;;  %vm1022_vm6 = vmor %vm381_vm1, %vm382_vm3  ;;  %v1026_v28 = vadd.f32 1.0, %v759_v6 }
  0x4d   : > { %v378_v3 = vsub.f32 1.0, %v377_v63  ;;  %v763_v59 = vpop.eup %762  ;;  %v344_v6 = vmul.f32 -0.5, %v1010_v11  ;;  %v347_v8 = vand.u32 2147483647, %v1010_v11 }
  0x4e   : > { %v360_v7 = vmul.f32 %v755_v50, %v359_v0  ;;  %766 = vrcp.f32 %v1026_v28  ;;  %v765_v62 = vpop.eup %764  ;;  %v1046_v0 = vld [vmem:[%s933_s25 + $0x70] sm:$0xff]  ;;  %vm453_vm11 = vweird.f32 %v1026_v28 }
  0x4f   : > { %v379_v15 = vmul.f32 %v757_v55, %v378_v3  ;;  %768 = vlog2.f32 %v467_v31  ;;  %vm330_vm8 = vcmp.eq.f32.partialorder %v1046_v0, 1.0  ;;  %v506_v4 = vadd.f32 %v765_v62, %v763_v59 }
  0x50   : > { %v361_v18 = vadd.f32 %v755_v50, %v360_v7  ;;  %770 = vpow2.f32 %v508_v35  ;;  %vm331_vm9 = vcmp.eq.f32.partialorder %v1046_v0, 0.0  ;;  %v345_v10 = vadd.f32 1.0, %v344_v6 }
  0x51   : > { %v380_v26 = vadd.f32 %v757_v55, %v379_v15  ;;  %v332_v13 = vsel %vm330_vm8, 1.0, %v839_v12  ;;  %v334_v19 = vsel %vm331_vm9, 1.0, %v839_v12  ;;  %vm348_vm10 = vcmp.lt.f32.partialorder %v347_v8, 0.0004427343 }
  0x52   : > { %v365_v29 = vsel %vm1014_vm5, %v755_v50, %v361_v18  ;;  %v471_v50 = vadd.f32 1e-16, %v470_v30  ;;  %v676_v18 = vld [vmem:[%s931_s24 + $0x10] sm:$0xff] }
  0x53   : > { %v370_v33 = vsel %vm1004_vm4, %v369_v14, %v365_v29  ;;  %v384_v34 = vsel %vm1022_vm6, %v757_v55, %v380_v26  ;;  %v346_v26 = vmul.f32 %v1010_v11, %v345_v10 }
  0x54   : > { %v389_v38 = vsel %vm386_vm7, %v388_v22, %v384_v34  ;;  %v398_v39 = vsub.f32 %v370_v33, %v397_v23  ;;  %v399_v41 = vadd.f32 %v397_v23, %v370_v33  ;;  %v1043_v63 = vpop.eup %766  ;;  %772 = vlog2.f32 %v471_v50  ;;  %v678_v22 = vld [vmem:[%s931_s24 + $0x18] sm:$0xff] }
  0x55   : > { %v401_v42 = vsub.f32 %v389_v38, %v400_v27  ;;  %v402_v45 = vadd.f32 %v400_v27, %v389_v38  ;;  %774 = vpow2.f32 %v512_v58  ;;  %v449_v16 = vmul.f32 %v1043_v63, %v1026_v28 }
  0x56   : > { %v409_v37 = vmin.f32 %v399_v41, %v980_v44  ;;  %v410_v40 = vmax.f32 %v398_v39, %v977_v43  ;;  %v418_v49 = vsub.f32 %v399_v41, %v398_v39  ;;  %v341_v44 = vadd.f32 1.0, %v1010_v11 }
  0x57   : > { %v413_v51 = vmin.f32 %v402_v45, %v994_v53  ;;  %v414_v55 = vmax.f32 %v401_v42, %v991_v52  ;;  %v419_v56 = vsub.f32 %v402_v45, %v401_v42  ;;  %v769_v52 = vpop.eup %768  ;;  %v474_v25 = vsub.f32 %v370_v33, %v966_v36 }
  0x58   : > { %v411_v57 = vsub.f32 %v409_v37, %v410_v40  ;;  %776 = vlog2.f32 %v341_v44  ;;  %v771_v5 = vpop.eup %770  ;;  %v469_v9 = vmul.f32 0.6931472, %v769_v52  ;;  %v533_v27 = vadd.f32 %v676_v18, %v332_v13 }
  0x59   : > { %v415_v54 = vsub.f32 %v413_v51, %v414_v55  ;;  %v420_v60 = vmul.f32 %v419_v56, %v418_v49  ;;  %v510_v17 = vadd.f32 %v771_v5, %v506_v4  ;;  %v537_v29 = vadd.f32 %v678_v22, %v334_v19 }
  0x5a   : > { %v412_v43 = vmax.f32 %v411_v57, 0.0  ;;  %v773_v14 = vpop.eup %772  ;;  %v476_v30 = vsub.f32 %v389_v38, %v984_v46  ;;  %677 = vst [vmem:[%s931_s24 + $0x10] sm:$0xff] %v533_v27  ;;  %v450_v35 = vsub.f32 1.0, %v449_v16  ;;  %v475_v36 = vmul.f32 %v474_v25, %v474_v25  ;;  %v524_v16 = vld [vmem:[%s931_s24] sm:$0xff] }
  0x5b   : > { %v416_v53 = vmax.f32 %v415_v54, 0.0  ;;  %v421_v1 = vand.u32 2147483647, %v420_v60  ;;  %v775_v23 = vpop.eup %774  ;;  %679 = vst [vmem:[%s931_s24 + $0x18] sm:$0xff] %v537_v29  ;;  %v473_v41 = vmul.f32 0.6931472, %v773_v14  ;;  %v479_v11 = vsub.f32 %v942_v20, %v469_v9 }
  0x5c   : > { %v514_v39 = vadd.f32 %v775_v23, %v510_v17  ;;  %v477_v33 = vmul.f32 %v476_v30, %v476_v30  ;;  %v451_v46 = vmul.f32 %v1043_v63, %v450_v35  ;;  %vm454_vm12 = vweird.f32 %v1043_v63  ;;  %v665_v9 = vld [vmem:[%s933_s25 + $0x68] sm:$0xff] }
  0x5d   : > { %v1049_v2 = vmul.f32 %v416_v53, %v412_v43  ;;  %v426_v3 = vadd.f32 %v425_v61, %v421_v1  ;;  %v480_v51 = vmul.f32 %v479_v11, %v479_v11  ;;  %v482_v20 = vsub.f32 %v945_v21, %v473_v41  ;;  %vm1082_vm15 = vmor %vm453_vm11, %vm454_vm12 }
  0x5e   : > { %v777_v31 = vpop.eup %776  ;;  %v478_v50 = vadd.f32 %v477_v33, %v475_v36  ;;  %v459_v57 = vand.u32 2147483648, %v1026_v28  ;;  %v452_v59 = vadd.f32 %v1043_v63, %v451_v46  ;;  %v457_v60 = vand.u32 2147483647, %v1026_v28 }
  0x5f   : > { %v427_v7 = vsub.f32 %v426_v3, %v1049_v2  ;;  %v343_v34 = vmul.f32 0.6931472, %v777_v31  ;;  %v483_v43 = vmul.f32 %v482_v20, %v482_v20 }
  0x60   : > { %v481_v62 = vadd.f32 %v480_v51, %v478_v50  ;;  %v460_v53 = vor.u32 1.1754944e-38, %v459_v57  ;;  %v456_v52 = vsel %vm1082_vm15, %v1043_v63, %v452_v59  ;;  %vm458_vm2 = vcmp.eq.f32.partialorder %v457_v60, 8.507059e+37 }
  0x61   : > { %v428_v15 = vadd.f32 1e-06, %v427_v7  ;;  %v349_v42 = vsel %vm348_vm10, %v346_v26, %v343_v34 }
  0x62   : > { %v350_v45 = vadd.f32 %v349_v42, %v336_v32  ;;  %v484_v5 = vadd.f32 %v483_v43, %v481_v62  ;;  %v461_v6 = vsel %vm458_vm2, %v460_v53, %v456_v52 }
  0x63   : > { %778 = vrcp.f32 %v428_v15  ;;  %v440_v49 = vand.u32 2147483648, %v428_v15  ;;  %vm434_vm13 = vweird.f32 %v428_v15  ;;  %v438_v56 = vand.u32 2147483647, %v428_v15 }
  0x64   : > { %780 = vlog2.f32 %v514_v39  ;;  %v351_v24 = vsel %vm331_vm9, %v350_v45, 0.0  ;;  %v519_v12 = vmul.f32 2.5, %v484_v5 }
  0x65   : > { %v529_v40 = vadd.f32 %v674_v48, %v351_v24  ;;  %v441_v21 = vor.u32 1.1754944e-38, %v440_v49  ;;  %vm439_vm1 = vcmp.eq.f32.partialorder %v438_v56, 8.507059e+37 }
  0x67   : > { %675 = vst [vmem:[%s931_s24 + $0x8] sm:$0xff] %v529_v40 }
  0x69   : > { %v779_v37 = vpop.eup %778 }
  0x6a   : > { %v430_v38 = vmul.f32 %v779_v37, %v428_v15  ;;  %vm435_vm14 = vweird.f32 %v779_v37  ;;  %v781_v61 = vpop.eup %780 }
  0x6b   : > { %vm436_vm0 = vmor %vm434_vm13, %vm435_vm14  ;;  %v516_v3 = vmul.f32 0.6931472, %v781_v61 }
  0x6c   : > { %v431_v55 = vsub.f32 1.0, %v430_v38 }
  0x6d   : > { %v517_v8 = vadd.f32 %v516_v3, %v987_v47 }
  0x6e   : > { %v432_v58 = vmul.f32 %v779_v37, %v431_v55 }
  0x6f   : > { %v518_v14 = vsub.f32 %v517_v8, %v665_v9 }
  0x70   : > { %v433_v44 = vadd.f32 %v779_v37, %v432_v58 }
  0x72   : > { %v437_v1 = vsel %vm436_vm0, %v779_v37, %v433_v44 }
  0x73   : > { %v442_v4 = vsel %vm439_vm1, %v441_v21, %v437_v1 }
  0x74   : > { %v443_v28 = vmul.f32 %v442_v4, %v1049_v2 }
  0x76   : > { %v463_v7 = vmul.f32 %v1046_v0, %v443_v28 }
  0x78   : > { %v464_v10 = vsub.f32 %v461_v6, %v463_v7 }
  0x7a   : > { %v465_v13 = vmul.f32 %v464_v10, %v464_v10 }
  0x7c   : > { %v520_v15 = vadd.f32 %v519_v12, %v465_v13 }
  0x7e   : > { %v521_v63 = vadd.f32 %v520_v15, %v518_v14 }
  0x80   : > { %v522_v17 = vsel %vm330_vm8, %v521_v63, 0.0 }
  0x81   : > { %v525_v18 = vadd.f32 %v524_v16, %v522_v17 }
  0x83   : > { %526 = vst [vmem:[%s931_s24] sm:$0xff] %v525_v18 }
  0x84 PF: > { %s12_s15 = sadd.s32 1, %s836_s15   ;;  %s1130_s9 = smov %s816_s10 }
  0x85   : > { %p9_p13 = scmp.ge.s32.totalorder %s12_s15, 8   ;;  %s1131_s10 = smov %s906_s22 }
  0x86   : > { %s1132_s11 = smov %s828_s13  ;;  %s1133_s12 = smov %s832_s14 }
  0x87   : > { %s1134_s13 = smov %s1137_s16  ;;  %s1135_s14 = smov %s1141_s17 }
  0x88   :  { %11 = sbr.rel (!%p9_p13) target bundleno = 4 (0x4), region = 128 }

</bundles_post_ra>
